<compile_context>
chip_gen: v7x
topology: tpu7x:2x2x1
jax: 0.10.0
libtpu: 0.0.40
codegen_flags: <defaults>
</compile_context>

<pallas_src>
import functools

import jax
import jax.numpy as jnp
from jax.experimental import pallas as pl
from jax.experimental.pallas import tpu as pltpu

_MIB = 1024 * 1024


def _round_up(x: int, m: int) -> int:
    return (x + m - 1) // m * m


@functools.lru_cache(maxsize=1)
def _vmem_budget_bytes():
    """(tile-selection budget, physical VMEM capacity) — generation aware."""
    cap = 64 * _MIB  # conservative default = v7x per-TC VMEM
    try:
        cap = int(getattr(pltpu.get_tpu_info(), "vmem_capacity_bytes", cap))
    except Exception:
        pass
    if cap <= 64 * _MIB:                       # v7x-class: leave generous headroom
        budget = min(cap - 24 * _MIB, 40 * _MIB)
    else:                                      # v5e / v6e-class (128 MiB)
        budget = min(int(cap * 0.75), 96 * _MIB)
    return max(budget, 16 * _MIB), cap


def _select_tiles(d_pad, f_pad, itemsize, sub, budget):
    """Pick (tile_n_cap, tile_f, resident_weights) under a VMEM byte budget."""
    bias_bytes = 2 * 2 * (f_pad + d_pad) * itemsize  # double-buffered biases (tiny)

    def fits(tile_n, tile_f, resident):
        xo = 2 * 2 * tile_n * d_pad * itemsize          # x + out tiles, double-buffered
        w = 2 * 2 * d_pad * tile_f * itemsize           # w1 + w2 slices (conservative 2x)
        h = tile_n * tile_f * (4 + itemsize)            # live ReLU interm. + cast copy
        acc = 0 if resident else tile_n * d_pad * 4     # f32 accumulator scratch
        return xo + w + h + acc + bias_bytes <= budget

    # 1) Prefer fully-resident weights: single pass, no scratch, weights DMA'd once.
    tile_n = 1024
    while tile_n >= sub:
        if fits(tile_n, f_pad, True):
            return tile_n, f_pad, True
        tile_n //= 2
    # 2) Fall back to an inner feed-forward reduction with the biggest tiles that fit.
    for tile_f in (2048, 1024, 512, 256, 128):
        if tile_f > f_pad:
            continue
        tile_n = 1024
        while tile_n >= sub:
            if fits(tile_n, tile_f, False):
                return tile_n, tile_f, False
            tile_n //= 2
    return sub, 128, False  # last resort; let the compiler try


def _pick_tile_n(N, sub, cap):
    """Largest row tile <= cap (multiple of sub); prefer one that divides N exactly
    (skips row padding / final slice) as long as it stays >= cap/2."""
    cap = max(sub, (cap // sub) * sub)
    if N >= sub and N % sub == 0:
        t = cap
        while t >= max(sub, cap // 2):
            if N % t == 0:
                return t
            t -= sub
    return min(cap, _round_up(N, sub))


def ffn_kernel_resident(x_ref, w1_ref, b1_ref, w2_ref, b2_ref, o_ref):
    """Whole feed-forward dim in one shot; weights are grid-resident."""
    h = jnp.dot(x_ref[...], w1_ref[...], preferred_element_type=jnp.float32)
    h = jnp.maximum(h + b1_ref[...].astype(jnp.float32), 0.0)
    acc = jnp.dot(h.astype(w2_ref.dtype), w2_ref[...],
                  preferred_element_type=jnp.float32)
    o_ref[...] = (acc + b2_ref[...].astype(jnp.float32)).astype(o_ref.dtype)


def ffn_kernel_reduction(x_ref, w1_ref, b1_ref, w2_ref, b2_ref, o_ref, acc_ref):
    """Inner reduction over feed-forward slices (exact: slices of F are independent
    through the ReLU).  First step writes dot+b2 directly (no zero-init RMW)."""
    f = pl.program_id(1)

    h = jnp.dot(x_ref[...], w1_ref[...], preferred_element_type=jnp.float32)
    h = jnp.maximum(h + b1_ref[...].astype(jnp.float32), 0.0)
    contrib = jnp.dot(h.astype(w2_ref.dtype), w2_ref[...],
                      preferred_element_type=jnp.float32)

    @pl.when(f == 0)
    def _first():
        acc_ref[...] = contrib + b2_ref[...].astype(jnp.float32)

    @pl.when(f > 0)
    def _accumulate():
        acc_ref[...] += contrib

    @pl.when(f == pl.num_programs(1) - 1)
    def _finalize():
        o_ref[...] = acc_ref[...].astype(o_ref.dtype)


@functools.partial(jax.jit, static_argnames=("compute_dtype",))
def positionwise_feed_forward(x, w1, b1, w2, b2, *, compute_dtype=None):
    """x: (B, S, dim_model). w1: (dim_model, dim_ff), b1: (dim_ff,),
    w2: (dim_ff, dim_model), b2: (dim_model,). Returns (B, S, dim_model).
    Set compute_dtype=jnp.bfloat16 for the peak MXU path (f32 accumulation kept)."""
    B, S, D = x.shape
    F_dim = w1.shape[1]
    N = B * S
    out_dtype = x.dtype

    if compute_dtype is not None:
        x = x.astype(compute_dtype)
        w1 = w1.astype(compute_dtype)
        w2 = w2.astype(compute_dtype)

    dtype = x.dtype
    itemsize = jnp.dtype(dtype).itemsize
    sub = max(8, 32 // itemsize)      # row-tile granularity: 8 (f32), 16 (bf16), 32 (fp8)

    d_pad = _round_up(D, 128)
    f_pad = _round_up(F_dim, 128)

    budget, vmem_cap = _vmem_budget_bytes()
    tile_n_cap, tile_f, resident = _select_tiles(d_pad, f_pad, itemsize, sub, budget)

    # Megacore (v7x): make sure the "parallel" row axis has >= 2 grid steps.
    if N >= 2 * sub:
        tile_n_cap = min(tile_n_cap, _round_up((N + 1) // 2, sub))
    tile_n = _pick_tile_n(N, sub, tile_n_cap)
    n_pad = _round_up(N, tile_n)

    if not resident:
        f_pad = _round_up(F_dim, tile_f)
        if f_pad // tile_f == 1:      # single reduction step => just run resident path
            resident, tile_f = True, f_pad

    # Conditional padding (exact: padded x cols / w1 rows contribute 0; padded F
    # columns give ReLU(0+0)=0 against zero w2 rows; padded out rows/cols sliced away).
    x2 = x.reshape(N, D)
    if n_pad != N or d_pad != D:
        x2 = jnp.pad(x2, ((0, n_pad - N), (0, d_pad - D)))
    w1p = w1 if (d_pad == D and f_pad == F_dim) else jnp.pad(
        w1, ((0, d_pad - D), (0, f_pad - F_dim)))
    b1p = (b1 if f_pad == F_dim else jnp.pad(b1, (0, f_pad - F_dim))).reshape(1, f_pad)
    w2p = w2 if (f_pad == F_dim and d_pad == D) else jnp.pad(
        w2, ((0, f_pad - F_dim), (0, d_pad - D)))
    b2p = (b2 if d_pad == D else jnp.pad(b2, (0, d_pad - D))).reshape(1, d_pad)

    n_tiles = n_pad // tile_n
    f_tiles = f_pad // tile_f

    # Accurate HBM traffic hint: weights are streamed once if resident, else once
    # per row tile (f innermost, i outer).
    weight_passes = 1 if resident else n_tiles
    w_bytes = (w1p.size * w1p.dtype.itemsize + w2p.size * w2p.dtype.itemsize)
    b_bytes = b1p.size * b1p.dtype.itemsize + b2p.size * b2p.dtype.itemsize
    cost = pl.CostEstimate(
        flops=4 * N * D * F_dim,
        transcendentals=0,
        bytes_accessed=x2.size * itemsize + n_pad * d_pad * jnp.dtype(out_dtype).itemsize
        + w_bytes * weight_passes + b_bytes,
    )

    vmem_limit = max(budget, min(budget + 32 * _MIB, int(vmem_cap * 0.9)))
    out_shape = jax.ShapeDtypeStruct((n_pad, d_pad), out_dtype)

    if resident:
        out2 = pl.pallas_call(
            ffn_kernel_resident,
            out_shape=out_shape,
            grid_spec=pltpu.PrefetchScalarGridSpec(
                num_scalar_prefetch=0,
                grid=(n_tiles,),
                in_specs=[
                    pl.BlockSpec((tile_n, d_pad), lambda i: (i, 0)),   # x rows
                    pl.BlockSpec((d_pad, f_pad), lambda i: (0, 0)),    # w1 (resident)
                    pl.BlockSpec((1, f_pad), lambda i: (0, 0)),        # b1 (resident)
                    pl.BlockSpec((f_pad, d_pad), lambda i: (0, 0)),    # w2 (resident)
                    pl.BlockSpec((1, d_pad), lambda i: (0, 0)),        # b2 (resident)
                ],
                out_specs=pl.BlockSpec((tile_n, d_pad), lambda i: (i, 0)),
            ),
            compiler_params=pltpu.CompilerParams(
                dimension_semantics=("parallel",),
                vmem_limit_bytes=vmem_limit,
            ),
            cost_estimate=cost,
        )(x2, w1p, b1p, w2p, b2p)
    else:
        out2 = pl.pallas_call(
            ffn_kernel_reduction,
            out_shape=out_shape,
            grid_spec=pltpu.PrefetchScalarGridSpec(
                num_scalar_prefetch=0,
                grid=(n_tiles, f_tiles),
                in_specs=[
                    pl.BlockSpec((tile_n, d_pad), lambda i, f: (i, 0)),   # x rows
                    pl.BlockSpec((d_pad, tile_f), lambda i, f: (0, f)),   # w1 slice
                    pl.BlockSpec((1, tile_f), lambda i, f: (0, f)),       # b1 slice
                    pl.BlockSpec((tile_f, d_pad), lambda i, f: (f, 0)),   # w2 slice
                    pl.BlockSpec((1, d_pad), lambda i, f: (0, 0)),        # b2 (resident)
                ],
                out_specs=pl.BlockSpec((tile_n, d_pad), lambda i, f: (i, 0)),
                scratch_shapes=[pltpu.VMEM((tile_n, d_pad), jnp.float32)],
            ),
            compiler_params=pltpu.CompilerParams(
                dimension_semantics=("parallel", "arbitrary"),
                vmem_limit_bytes=vmem_limit,
            ),
            cost_estimate=cost,
        )(x2, w1p, b1p, w2p, b2p)

    if n_pad != N or d_pad != D:
        out2 = out2[:N, :D]
    return out2.reshape(B, S, D)


if __name__ == "__main__":
    # Small shapes consistent with the module: (batch, seq, dim_model), hidden dim_feedforward.
    B, S, D, FF = 2, 8, 32, 64
    key = jax.random.PRNGKey(0)
    kx, kw1, kb1, kw2, kb2 = jax.random.split(key, 5)

    x = jax.random.normal(kx, (B, S, D), dtype=jnp.float32)

    # PyTorch nn.Linear stores weight as (out, in) and computes y = x @ W^T + b;
    # here we directly build the (in, out) matrices.
    w1 = jax.random.normal(kw1, (D, FF), dtype=jnp.float32) * 0.1
    b1 = jax.random.normal(kb1, (FF,), dtype=jnp.float32) * 0.1
    w2 = jax.random.normal(kw2, (FF, D), dtype=jnp.float32) * 0.1
    b2 = jax.random.normal(kb2, (D,), dtype=jnp.float32) * 0.1

    out = positionwise_feed_forward(x, w1, b1, w2, b2)
    jax.block_until_ready(out)

    # Pure-JAX reference check of the forward semantics.
    ref = jnp.maximum(x @ w1 + b1, 0.0) @ w2 + b2
    assert out.shape == (B, S, D)
    assert jnp.allclose(out, ref, atol=1e-5, rtol=1e-5)

    print("KERNEL_OK")
</pallas_src>

<mosaic_0001>
module attributes {stable_mosaic.version = 11 : i64} {
  func.func @ffn_kernel_resident(%arg0: i32, %arg1: memref<8x128xf32, #tpu.memory_space<vmem>>, %arg2: memref<128x128xf32, #tpu.memory_space<vmem>>, %arg3: memref<1x128xf32, #tpu.memory_space<vmem>>, %arg4: memref<128x128xf32, #tpu.memory_space<vmem>>, %arg5: memref<1x128xf32, #tpu.memory_space<vmem>>, %arg6: memref<8x128xf32, #tpu.memory_space<vmem>>) attributes {dimension_semantics = [#tpu.dimension_semantics<parallel>], iteration_bounds = array<i64: 2>, scalar_prefetch = 0 : i64, scratch_operands = 0 : i64, tpu.core_type = #tpu.core_type<tc>, window_params = [{transform_indices = @transform_0, window_bounds = array<i64: 8, 128>}, {pipeline_mode = #tpu.pipeline_mode<synchronous>, transform_indices = @transform_1, window_bounds = array<i64: 128, 128>}, {pipeline_mode = #tpu.pipeline_mode<synchronous>, transform_indices = @transform_2, window_bounds = array<i64: 1, 128>}, {pipeline_mode = #tpu.pipeline_mode<synchronous>, transform_indices = @transform_3, window_bounds = array<i64: 128, 128>}, {pipeline_mode = #tpu.pipeline_mode<synchronous>, transform_indices = @transform_4, window_bounds = array<i64: 1, 128>}, {transform_indices = @transform_5, window_bounds = array<i64: 8, 128>}]} {
    %c0 = arith.constant 0 : index
    %c0_0 = arith.constant 0 : index
    %0 = vector.load %arg1[%c0, %c0_0] : memref<8x128xf32, #tpu.memory_space<vmem>>, vector<8x128xf32>
    %c0_1 = arith.constant 0 : index
    %c0_2 = arith.constant 0 : index
    %1 = vector.load %arg2[%c0_1, %c0_2] : memref<128x128xf32, #tpu.memory_space<vmem>>, vector<128x128xf32>
    %cst = arith.constant dense<0.000000e+00> : vector<8x128xf32>
    %2 = tpu.matmul %0, %1, %cst {dimension_numbers = #tpu.dot_dimension_numbers<[1], [0], [0], [1], [0, 0, 1, 1], [], []>} : vector<8x128xf32>, vector<128x128xf32>, vector<8x128xf32> -> vector<8x128xf32>
    %c0_3 = arith.constant 0 : index
    %c0_4 = arith.constant 0 : index
    %3 = vector.load %arg3[%c0_3, %c0_4] : memref<1x128xf32, #tpu.memory_space<vmem>>, vector<1x128xf32>
    %4 = vector.broadcast %3 : vector<1x128xf32> to vector<8x128xf32>
    %5 = arith.addf %2, %4 : vector<8x128xf32>
    %cst_5 = arith.constant 0.000000e+00 : f32
    %6 = vector.broadcast %cst_5 : f32 to vector<8x128xf32>
    %7 = arith.maximumf %5, %6 : vector<8x128xf32>
    %c0_6 = arith.constant 0 : index
    %c0_7 = arith.constant 0 : index
    %8 = vector.load %arg4[%c0_6, %c0_7] : memref<128x128xf32, #tpu.memory_space<vmem>>, vector<128x128xf32>
    %cst_8 = arith.constant dense<0.000000e+00> : vector<8x128xf32>
    %9 = tpu.matmul %7, %8, %cst_8 {dimension_numbers = #tpu.dot_dimension_numbers<[1], [0], [0], [1], [0, 0, 1, 1], [], []>} : vector<8x128xf32>, vector<128x128xf32>, vector<8x128xf32> -> vector<8x128xf32>
    %c0_9 = arith.constant 0 : index
    %c0_10 = arith.constant 0 : index
    %10 = vector.load %arg5[%c0_9, %c0_10] : memref<1x128xf32, #tpu.memory_space<vmem>>, vector<1x128xf32>
    %11 = vector.broadcast %10 : vector<1x128xf32> to vector<8x128xf32>
    %12 = arith.addf %9, %11 : vector<8x128xf32>
    %c0_11 = arith.constant 0 : index
    %c0_12 = arith.constant 0 : index
    %13 = vector.load %arg6[%c0_11, %c0_12] : memref<8x128xf32, #tpu.memory_space<vmem>>, vector<8x128xf32>
    tpu.vector_store %arg6[%c0_11, %c0_12], %12 {strides = array<i32>} : memref<8x128xf32, #tpu.memory_space<vmem>>, vector<8x128xf32>,
    return
  }
  func.func @transform_0(%arg0: i32) -> (i32, i32) {
    %c0_i32 = arith.constant 0 : i32
    %c0_i32_0 = arith.constant 0 : i32
    return %arg0, %c0_i32 : i32, i32
  }
  func.func @transform_1(%arg0: i32) -> (i32, i32) {
    %c0_i32 = arith.constant 0 : i32
    %c0_i32_0 = arith.constant 0 : i32
    %c0_i32_1 = arith.constant 0 : i32
    return %c0_i32, %c0_i32_0 : i32, i32
  }
  func.func @transform_2(%arg0: i32) -> (i32, i32) {
    %c0_i32 = arith.constant 0 : i32
    %c0_i32_0 = arith.constant 0 : i32
    %c0_i32_1 = arith.constant 0 : i32
    return %c0_i32, %c0_i32_0 : i32, i32
  }
  func.func @transform_3(%arg0: i32) -> (i32, i32) {
    %c0_i32 = arith.constant 0 : i32
    %c0_i32_0 = arith.constant 0 : i32
    %c0_i32_1 = arith.constant 0 : i32
    return %c0_i32, %c0_i32_0 : i32, i32
  }
  func.func @transform_4(%arg0: i32) -> (i32, i32) {
    %c0_i32 = arith.constant 0 : i32
    %c0_i32_0 = arith.constant 0 : i32
    %c0_i32_1 = arith.constant 0 : i32
    return %c0_i32, %c0_i32_0 : i32, i32
  }
  func.func @transform_5(%arg0: i32) -> (i32, i32) {
    %c0_i32 = arith.constant 0 : i32
    %c0_i32_0 = arith.constant 0 : i32
    return %arg0, %c0_i32 : i32, i32
  }
}

</mosaic_0001>

<bundles_post_ra>
// kernel: positionwise_feed_forward.1
= control target key start
LH: loop header
LB: loop body
LE: loop exit
PB: predicated region body
PF: predicated region fallthrough
CT: control target
= control target key end

     0   :  { %s677_s18 = smov 0   ;;  %s819_s0 = inlined_call_operand.vmem [shape: f32[16,128], index: 0, kind: input, shape index: {}]   ;;  %s820_s1 = inlined_call_operand.vmem [shape: f32[128,128], index: 1, kind: input, shape index: {}]   ;;  %s821_s2 = inlined_call_operand.vmem [shape: f32[1,128], index: 2, kind: input, shape index: {}]   ;;  %s822_s3 = inlined_call_operand.vmem [shape: f32[128,128], index: 3, kind: input, shape index: {}]   ;;  %s823_s4 = inlined_call_operand.vmem [shape: f32[1,128], index: 4, kind: input, shape index: {}]   ;;  %s824_s5 = inlined_call_operand.vmem [shape: f32[16,128], index: 5, kind: output, shape index: {}]  }
   0x1 LB: > { %s462_s19 = sadd.s32 4294967295, %s642_s18   ;;  %p466_p0 = scmp.ge.s32.totalorder %s642_s18, 1  ;;  %s642_s18 = sphi %s677_s18, %s15_s18  }
   0x2   : > { %p186_p1 = scmp.lt.s32.totalorder %s642_s18, 3 }
   0x4   : > { %p187_p2 = pnand %p466_p0, %p186_p1 }
   0x5   : > { %v221_v0 = vld [vmem:[%s820_s1] sm:$0xff] (!%p187_p2)  ;;  %v222_v1 = vld [vmem:[%s820_s1 + $0x8] sm:$0xff] (!%p187_p2)  ;;  %v223_v2 = vld [vmem:[%s820_s1 + $0x10] sm:$0xff] (!%p187_p2)  ;;  %v644_v3 = vmov (!%p187_p2), 0.0|0.0   ;;  %vm645_vm0 = vmmov (!%p187_p2), 0   ;;  %v646_v6 = vmov (!%p187_p2), 0.0  }
   0x6   : > { %190 = sbr.rel (%p187_p2) target bundleno = 470 (0x1d6), region = 40  ;;  %577 = vmatprep.subr.bf16.mxu0 (!%p187_p2), %v644_v3  ;;  %v578_v4 = vpack.c.bf16 (!%p187_p2), %v222_v1, %v221_v0  ;;  %v224_v5 = vld [vmem:[%s820_s1 + $0x18] sm:$0xff] (!%p187_p2)  ;;  %539 = vmatprep.mubr.msk.f32.mxu0 (!%p187_p2), %vm645_vm0, %v646_v6  ;;  %v225_v8 = vld [vmem:[%s820_s1 + $0x20] sm:$0xff] (!%p187_p2)  ;;  %v226_v9 = vld [vmem:[%s820_s1 + $0x28] sm:$0xff] (!%p187_p2)  ;;  %p212_p3 = scmp.lt.s32.totalorder (!%p187_p2), %s462_s19, 1 }
   0x7   : > { %601 = vmatprep.subr.bf16.mxu1 (!%p187_p2), %v644_v3  ;;  %574 = vmatprep.mubr.msk.f32.mxu1 (!%p187_p2), %vm645_vm0, %v646_v6  ;;  %v581_v7 = vpack.c.bf16 (!%p187_p2), %v224_v5, %v223_v2  ;;  %v315_v10 = vld [vmem:[%s822_s3] sm:$0xff] (!%p187_p2)  ;;  %v316_v11 = vld [vmem:[%s822_s3 + $0x8] sm:$0xff] (!%p187_p2)  ;;  %v317_v13 = vld [vmem:[%s822_s3 + $0x10] sm:$0xff] (!%p187_p2)  ;;  %v584_v15 = vpack.c.bf16 (!%p187_p2), %v226_v9, %v225_v8 }
   0x8   : > { %579 = vmatpush3.bf16.msra.mxu0 (!%p187_p2), %v578_v4  ;;  %v602_v12 = vpack.c.bf16 (!%p187_p2), %v316_v11, %v315_v10  ;;  %v318_v14 = vld [vmem:[%s822_s3 + $0x18] sm:$0xff] (!%p187_p2)  ;;  %v227_v16 = vld [vmem:[%s820_s1 + $0x30] sm:$0xff] (!%p187_p2)  ;;  %v319_v19 = vld [vmem:[%s822_s3 + $0x20] sm:$0xff] (!%p187_p2) }
   0x9   : > { %580 = vmatprep.subr.bf16.mxu0 (!%p187_p2), %v644_v3  ;;  %v228_v17 = vld [vmem:[%s820_s1 + $0x38] sm:$0xff] (!%p187_p2)  ;;  %v605_v18 = vpack.c.bf16 (!%p187_p2), %v318_v14, %v317_v13  ;;  %v320_v20 = vld [vmem:[%s822_s3 + $0x28] sm:$0xff] (!%p187_p2)  ;;  %v229_v22 = vld [vmem:[%s820_s1 + $0x40] sm:$0xff] (!%p187_p2) }
   0xa   : > { %603 = vmatpush3.bf16.msra.mxu1 (!%p187_p2), %v602_v12  ;;  %v587_v21 = vpack.c.bf16 (!%p187_p2), %v228_v17, %v227_v16  ;;  %v230_v23 = vld [vmem:[%s820_s1 + $0x48] sm:$0xff] (!%p187_p2)  ;;  %v608_v24 = vpack.c.bf16 (!%p187_p2), %v320_v20, %v319_v19  ;;  %v321_v25 = vld [vmem:[%s822_s3 + $0x30] sm:$0xff] (!%p187_p2)  ;;  %v322_v26 = vld [vmem:[%s822_s3 + $0x38] sm:$0xff] (!%p187_p2) }
   0xb   : > { %604 = vmatprep.subr.bf16.mxu1 (!%p187_p2), %v644_v3  ;;  %v590_v27 = vpack.c.bf16 (!%p187_p2), %v230_v23, %v229_v22  ;;  %v231_v28 = vld [vmem:[%s820_s1 + $0x50] sm:$0xff] (!%p187_p2)  ;;  %v232_v29 = vld [vmem:[%s820_s1 + $0x58] sm:$0xff] (!%p187_p2)  ;;  %v611_v30 = vpack.c.bf16 (!%p187_p2), %v322_v26, %v321_v25  ;;  %v323_v31 = vld [vmem:[%s822_s3 + $0x40] sm:$0xff] (!%p187_p2) }
   0xc   : > { %582 = vmatpush3.bf16.msra.mxu0 (!%p187_p2), %v581_v7  ;;  %v324_v32 = vld [vmem:[%s822_s3 + $0x48] sm:$0xff] (!%p187_p2)  ;;  %v593_v33 = vpack.c.bf16 (!%p187_p2), %v232_v29, %v231_v28  ;;  %v233_v34 = vld [vmem:[%s820_s1 + $0x60] sm:$0xff] (!%p187_p2)  ;;  %v325_v37 = vld [vmem:[%s822_s3 + $0x50] sm:$0xff] (!%p187_p2) }
   0xd   : > { %583 = vmatprep.subr.bf16.mxu0 %v644_v3  ;;  %v234_v35 = vld [vmem:[%s820_s1 + $0x68] sm:$0xff]  ;;  %v614_v36 = vpack.c.bf16 %v324_v32, %v323_v31  ;;  %s826_s19 = smov (!%p212_p3, %s462_s19), 1  ;;  %v326_v38 = vld [vmem:[%s822_s3 + $0x58] sm:$0xff]  ;;  %v235_v40 = vld [vmem:[%s820_s1 + $0x70] sm:$0xff] }
   0xe   : > { %606 = vmatpush3.bf16.msra.mxu1 %v605_v18  ;;  %v596_v39 = vpack.c.bf16 %v234_v35, %v233_v34  ;;  %v236_v41 = vld [vmem:[%s820_s1 + $0x78] sm:$0xff]  ;;  %v617_v42 = vpack.c.bf16 %v326_v38, %v325_v37  ;;  %s467_s30 = sshll.u32 %s826_s19, 3  ;;  %v327_v43 = vld [vmem:[%s822_s3 + $0x60] sm:$0xff]  ;;  %v328_v44 = vld [vmem:[%s822_s3 + $0x68] sm:$0xff] }
   0xf   : > { %607 = vmatprep.subr.bf16.mxu1 %v644_v3  ;;  %v599_v45 = vpack.c.bf16 %v236_v41, %v235_v40  ;;  %s215_s12 = scalar_lea.vmem %s819_s0, %s467_s30  ;;  %v620_v46 = vpack.c.bf16 %v328_v44, %v327_v43  ;;  %v329_v48 = vld [vmem:[%s822_s3 + $0x70] sm:$0xff]  ;;  %v330_v49 = vld [vmem:[%s822_s3 + $0x78] sm:$0xff]  ;;  %v469_v51 = vld [vmem:[%s821_s2] ss:$0 sm:$0xff]  ;;  %s219_s24 = scalar_lea.vmem %s824_s5, %s467_s30 }
  0x10   : > { %585 = vmatpush3.bf16.msra.mxu0 %v584_v15  ;;  %v220_v47 = vld [vmem:[%s215_s12] sm:$0xff]  ;;  %v623_v50 = vpack.c.bf16 %v330_v49, %v329_v48 }
  0x11   : > { %586 = vmatprep.subr.bf16.mxu0 %v644_v3  ;;  %v470_v56 = vld [vmem:[%s823_s4] ss:$0 sm:$0xff] }
  0x12   : > { %609 = vmatpush3.bf16.msra.mxu1 %v608_v24 }
  0x13   : > { %610 = vmatprep.subr.bf16.mxu1 %v644_v3 }
  0x14   : > { %588 = vmatpush3.bf16.msra.mxu0 %v587_v21 }
  0x15   : > { %589 = vmatprep.subr.bf16.mxu0 %v644_v3 }
  0x16   : > { %612 = vmatpush3.bf16.msra.mxu1 %v611_v30 }
  0x17   : > { %613 = vmatprep.subr.bf16.mxu1 %v644_v3 }
  0x18   : > { %591 = vmatpush3.bf16.msra.mxu0 %v590_v27 }
  0x19   : > { %592 = vmatprep.subr.bf16.mxu0 %v644_v3 }
  0x1a   : > { %615 = vmatpush3.bf16.msra.mxu1 %v614_v36 }
  0x1b   : > { %616 = vmatprep.subr.bf16.mxu1 %v644_v3 }
  0x1c   : > { %594 = vmatpush3.bf16.msra.mxu0 %v593_v33 }
  0x1d   : > { %595 = vmatprep.subr.bf16.mxu0 %v644_v3 }
  0x1e   : > { %618 = vmatpush3.bf16.msra.mxu1 %v617_v42 }
  0x1f   : > { %619 = vmatprep.subr.bf16.mxu1 %v644_v3 }
  0x20   : > { %597 = vmatpush3.bf16.msra.mxu0 %v596_v39 }
  0x21   : > { %598 = vmatprep.subr.bf16.mxu0 %v644_v3 }
  0x22   : > { %621 = vmatpush3.bf16.msra.mxu1 %v620_v46 }
  0x23   : > { %622 = vmatprep.subr.bf16.mxu1 %v644_v3 }
  0x24   : > { %600 = vmatpush3.bf16.msra.mxu0 %v599_v45 }
  0x26   : > { %624 = vmatpush3.bf16.msra.mxu1 %v623_v50 }
  0x27   : > { %540 = vmatmul.mubr.f32.vlgmr.msra.gmra.mrb[0].mxu0 %v220_v47 }
  0xfa   : > { %v310_v52 = vpop.f32.mrb[0].mxu0 }
  0xfb   : > { %v311_v53 = vadd.f32 %v469_v51, %v310_v52  ;;  %v541_v54 = vpop.f32.mrb[1].mxu0 }
  0xfd   : > { %v314_v55 = vmax.f32 %v311_v53, 0.0 }
  0xff   : > { %575 = vmatmul.mubr.f32.vlgmr.msra.gmra.mrb[0].mxu1 %v314_v55 }
 0x1d2   : > { %v404_v57 = vpop.f32.mrb[0].mxu1 }
 0x1d3   : > { %v405_v58 = vadd.f32 %v470_v56, %v404_v57  ;;  %v576_v59 = vpop.f32.mrb[1].mxu1 }
 0x1d5   : > { %408 = vst [vmem:[%s219_s24] sm:$0xff] %v405_v58 }
 0x1d6 PF: > { %s15_s18 = sadd.s32 1, %s642_s18  }
 0x1d7   : > { %p12_p4 = scmp.ge.s32.totalorder %s15_s18, 4  }
 0x1d9   :  { %14 = sbr.rel (!%p12_p4) target bundleno = 1 (0x1), region = 70 }

</bundles_post_ra>
